<compile_context>
chip_gen: v6e
topology: v6e:2x2x1
jax: 0.10.0
libtpu: 0.0.40
codegen_flags: <defaults>
</compile_context>

<pallas_src>
import jax
import jax.numpy as jnp
from jax.experimental import pallas as pl
from jax.experimental.pallas import tpu as pltpu

HID = 128  # self.hid1_size in the PyTorch module


def _round_up(x, m):
    return ((x + m - 1) // m) * m


def actor_kernel(obs_ref, w1_ref, b1_ref, w2_ref, b2_ref, w3_ref, b3_ref, out_ref):
    mm_dtype = w1_ref.dtype  # bf16 on the fast path, f32 on the reference path

    # fc1 + ReLU  (obs cast to the MXU dtype in-kernel; f32 accumulate/elementwise)
    h1 = jnp.dot(obs_ref[...].astype(mm_dtype), w1_ref[...],
                 preferred_element_type=jnp.float32)
    h1 = jnp.maximum(h1 + b1_ref[...], 0.0)

    # fc2 + ReLU
    h2 = jnp.dot(h1.astype(mm_dtype), w2_ref[...],
                 preferred_element_type=jnp.float32)
    h2 = jnp.maximum(h2 + b2_ref[...], 0.0)

    # fc3 (weight padded to N=128 for a clean MXU pass) + tanh on the real
    # act_dim columns only; the store is narrow (masked vst) but the HBM
    # writeback carries no pad bytes.
    h3 = jnp.dot(h2.astype(mm_dtype), w3_ref[...],
                 preferred_element_type=jnp.float32)
    act_dim = out_ref.shape[-1]
    out_ref[...] = jnp.tanh(h3[:, :act_dim] + b3_ref[...]).astype(out_ref.dtype)


def actor_forward(obs, params, *, tm=None, use_bf16=True):
    """obs: [B, obs_dim] float32; params: dict of w1,b1,w2,b2,w3,b3."""
    B, obs_dim = obs.shape
    hid = params["w1"].shape[1]
    act_dim = params["w3"].shape[1]

    # ---- pad only the fc3 weight columns to the lane width -------------------
    n3 = max(128, _round_up(act_dim, 128))
    w3 = params["w3"]
    if n3 != act_dim:
        w3 = jnp.pad(w3, ((0, 0), (0, n3 - act_dim)))

    # ---- batch tiling ---------------------------------------------------------
    if tm is None:
        b_aligned = _round_up(B, 8)
        if b_aligned >= 16:
            # Big tiles to amortize per-step overhead, but cap at ~half the
            # batch so there are always >= 2 grid steps (v7x: 2 TensorCores).
            tm = min(1024, _round_up(b_aligned // 2, 8))
        else:
            tm = b_aligned
    b_pad = _round_up(B, tm)
    obs_p = obs if b_pad == B else jnp.pad(obs, ((0, b_pad - B), (0, 0)))
    obs_p = obs_p.astype(jnp.float32)  # stays f32; cast to bf16 happens in-kernel

    # ---- dtype staging: bf16 weights into the MXU, f32 biases/elementwise -----
    mm_dtype = jnp.bfloat16 if use_bf16 else jnp.float32
    w1 = params["w1"].astype(mm_dtype)
    w2 = params["w2"].astype(mm_dtype)
    w3 = w3.astype(mm_dtype)
    b1 = params["b1"].astype(jnp.float32)
    b2 = params["b2"].astype(jnp.float32)
    b3 = params["b3"].astype(jnp.float32)

    grid = (b_pad // tm,)

    def row_spec(d):
        return pl.BlockSpec((tm, d), lambda i: (i, 0))

    def resident_spec(shape):
        # Constant index_map -> weight/bias block stays resident across steps.
        return pl.BlockSpec(shape, lambda i: (0, 0))

    itemsize = jnp.dtype(mm_dtype).itemsize
    flops = 2 * b_pad * (obs_dim * hid + hid * hid + hid * n3)
    bytes_accessed = (obs_p.size * 4
                      + (w1.size + w2.size + w3.size) * itemsize
                      + (b1.size + b2.size + b3.size) * 4
                      + b_pad * act_dim * 4)

    out = pl.pallas_call(
        actor_kernel,
        out_shape=jax.ShapeDtypeStruct((b_pad, act_dim), jnp.float32),
        grid=grid,
        in_specs=[
            row_spec(obs_dim),
            resident_spec(w1.shape), resident_spec(b1.shape),
            resident_spec(w2.shape), resident_spec(b2.shape),
            resident_spec(w3.shape), resident_spec(b3.shape),
        ],
        out_specs=pl.BlockSpec((tm, act_dim), lambda i: (i, 0)),
        compiler_params=pltpu.CompilerParams(
            dimension_semantics=("parallel",),      # shard batch over TCs (v7x)
            vmem_limit_bytes=32 * 1024 * 1024,
        ),
        cost_estimate=pl.CostEstimate(
            flops=int(flops),
            transcendentals=int(b_pad * act_dim),
            bytes_accessed=int(bytes_accessed),
        ),
    )(obs_p, w1, b1, w2, b2, w3, b3)

    return out[:B]


def init_params(key, obs_dim, act_dim):
    """Deterministic init mirroring torch.nn.Linear default (uniform ±1/sqrt(fan_in))."""
    ks = jax.random.split(key, 6)

    def linear(kw, kb, fan_in, fan_out):
        bound = 1.0 / jnp.sqrt(fan_in)
        w = jax.random.uniform(kw, (fan_in, fan_out), jnp.float32, -bound, bound)
        b = jax.random.uniform(kb, (1, fan_out), jnp.float32, -bound, bound)
        return w, b

    w1, b1 = linear(ks[0], ks[1], obs_dim, HID)
    w2, b2 = linear(ks[2], ks[3], HID, HID)
    w3, b3 = linear(ks[4], ks[5], HID, act_dim)
    return {"w1": w1, "b1": b1, "w2": w2, "b2": b2, "w3": w3, "b3": b3}


def actor_reference(obs, p):
    h1 = jnp.maximum(obs @ p["w1"] + p["b1"], 0.0)
    h2 = jnp.maximum(h1 @ p["w2"] + p["b2"], 0.0)
    return jnp.tanh(h2 @ p["w3"] + p["b3"])


if __name__ == "__main__":
    key = jax.random.PRNGKey(0)
    k_obs, k_par = jax.random.split(key)

    obs_dim, act_dim = 16, 8
    params = init_params(k_par, obs_dim, act_dim)

    # --- small batch (single grid step) ---------------------------------------
    obs = jax.random.normal(k_obs, (8, obs_dim), jnp.float32)
    ref = actor_reference(obs, params)

    means_f32 = actor_forward(obs, params, use_bf16=False)
    jax.block_until_ready(means_f32)
    assert means_f32.shape == (8, act_dim)
    assert jnp.allclose(means_f32, ref, atol=1e-5, rtol=1e-5)

    means_bf16 = actor_forward(obs, params, use_bf16=True)
    jax.block_until_ready(means_bf16)
    assert means_bf16.shape == (8, act_dim)
    assert jnp.allclose(means_bf16, ref, atol=2e-2, rtol=2e-2)

    # --- ragged batch exercising multi-step grid + batch padding --------------
    obs2 = jax.random.normal(jax.random.PRNGKey(1), (40, obs_dim), jnp.float32)
    ref2 = actor_reference(obs2, params)
    means2 = actor_forward(obs2, params, use_bf16=False)
    jax.block_until_ready(means2)
    assert means2.shape == (40, act_dim)
    assert jnp.allclose(means2, ref2, atol=1e-5, rtol=1e-5)

    print("KERNEL_OK")
</pallas_src>

<mosaic_0001>
module attributes {stable_mosaic.version = 11 : i64} {
  func.func @actor_kernel(%arg0: i32, %arg1: memref<8x16xf32, #tpu.memory_space<vmem>>, %arg2: memref<16x128xf32, #tpu.memory_space<vmem>>, %arg3: memref<1x128xf32, #tpu.memory_space<vmem>>, %arg4: memref<128x128xf32, #tpu.memory_space<vmem>>, %arg5: memref<1x128xf32, #tpu.memory_space<vmem>>, %arg6: memref<128x128xf32, #tpu.memory_space<vmem>>, %arg7: memref<1x8xf32, #tpu.memory_space<vmem>>, %arg8: memref<8x8xf32, #tpu.memory_space<vmem>>) attributes {dimension_semantics = [#tpu.dimension_semantics<parallel>], iteration_bounds = array<i64: 1>, scalar_prefetch = 0 : i64, scratch_operands = 0 : i64, tpu.core_type = #tpu.core_type<tc>, window_params = [{transform_indices = @transform_0, window_bounds = array<i64: 8, 16>}, {pipeline_mode = #tpu.pipeline_mode<synchronous>, transform_indices = @transform_1, window_bounds = array<i64: 16, 128>}, {pipeline_mode = #tpu.pipeline_mode<synchronous>, transform_indices = @transform_2, window_bounds = array<i64: 1, 128>}, {pipeline_mode = #tpu.pipeline_mode<synchronous>, transform_indices = @transform_3, window_bounds = array<i64: 128, 128>}, {pipeline_mode = #tpu.pipeline_mode<synchronous>, transform_indices = @transform_4, window_bounds = array<i64: 1, 128>}, {pipeline_mode = #tpu.pipeline_mode<synchronous>, transform_indices = @transform_5, window_bounds = array<i64: 128, 128>}, {pipeline_mode = #tpu.pipeline_mode<synchronous>, transform_indices = @transform_6, window_bounds = array<i64: 1, 8>}, {transform_indices = @transform_7, window_bounds = array<i64: 8, 8>}]} {
    %c0 = arith.constant 0 : index
    %c0_0 = arith.constant 0 : index
    %0 = vector.load %arg1[%c0, %c0_0] : memref<8x16xf32, #tpu.memory_space<vmem>>, vector<8x16xf32>
    %c0_1 = arith.constant 0 : index
    %c0_2 = arith.constant 0 : index
    %1 = vector.load %arg2[%c0_1, %c0_2] : memref<16x128xf32, #tpu.memory_space<vmem>>, vector<16x128xf32>
    %cst = arith.constant dense<0.000000e+00> : vector<8x128xf32>
    %2 = tpu.matmul %0, %1, %cst {dimension_numbers = #tpu.dot_dimension_numbers<[1], [0], [0], [1], [0, 0, 1, 1], [], []>} : vector<8x16xf32>, vector<16x128xf32>, vector<8x128xf32> -> vector<8x128xf32>
    %c0_3 = arith.constant 0 : index
    %c0_4 = arith.constant 0 : index
    %3 = vector.load %arg3[%c0_3, %c0_4] : memref<1x128xf32, #tpu.memory_space<vmem>>, vector<1x128xf32>
    %4 = vector.broadcast %3 : vector<1x128xf32> to vector<8x128xf32>
    %5 = arith.addf %2, %4 : vector<8x128xf32>
    %cst_5 = arith.constant 0.000000e+00 : f32
    %6 = vector.broadcast %cst_5 : f32 to vector<8x128xf32>
    %7 = arith.maximumf %5, %6 : vector<8x128xf32>
    %c0_6 = arith.constant 0 : index
    %c0_7 = arith.constant 0 : index
    %8 = vector.load %arg4[%c0_6, %c0_7] : memref<128x128xf32, #tpu.memory_space<vmem>>, vector<128x128xf32>
    %cst_8 = arith.constant dense<0.000000e+00> : vector<8x128xf32>
    %9 = tpu.matmul %7, %8, %cst_8 {dimension_numbers = #tpu.dot_dimension_numbers<[1], [0], [0], [1], [0, 0, 1, 1], [], []>} : vector<8x128xf32>, vector<128x128xf32>, vector<8x128xf32> -> vector<8x128xf32>
    %c0_9 = arith.constant 0 : index
    %c0_10 = arith.constant 0 : index
    %10 = vector.load %arg5[%c0_9, %c0_10] : memref<1x128xf32, #tpu.memory_space<vmem>>, vector<1x128xf32>
    %11 = vector.broadcast %10 : vector<1x128xf32> to vector<8x128xf32>
    %12 = arith.addf %9, %11 : vector<8x128xf32>
    %cst_11 = arith.constant 0.000000e+00 : f32
    %13 = vector.broadcast %cst_11 : f32 to vector<8x128xf32>
    %14 = arith.maximumf %12, %13 : vector<8x128xf32>
    %c0_12 = arith.constant 0 : index
    %c0_13 = arith.constant 0 : index
    %15 = vector.load %arg6[%c0_12, %c0_13] : memref<128x128xf32, #tpu.memory_space<vmem>>, vector<128x128xf32>
    %cst_14 = arith.constant dense<0.000000e+00> : vector<8x128xf32>
    %16 = tpu.matmul %14, %15, %cst_14 {dimension_numbers = #tpu.dot_dimension_numbers<[1], [0], [0], [1], [0, 0, 1, 1], [], []>} : vector<8x128xf32>, vector<128x128xf32>, vector<8x128xf32> -> vector<8x128xf32>
    %17 = vector.extract_strided_slice %16 {offsets = [0, 0], sizes = [8, 8], strides = [1, 1]} : vector<8x128xf32> to vector<8x8xf32>
    %c0_15 = arith.constant 0 : index
    %c0_16 = arith.constant 0 : index
    %18 = vector.load %arg7[%c0_15, %c0_16] : memref<1x8xf32, #tpu.memory_space<vmem>>, vector<1x8xf32>
    %19 = vector.broadcast %18 : vector<1x8xf32> to vector<8x8xf32>
    %20 = arith.addf %17, %19 : vector<8x8xf32>
    %21 = math.tanh %20 : vector<8x8xf32>
    %c0_17 = arith.constant 0 : index
    %c0_18 = arith.constant 0 : index
    %22 = vector.load %arg8[%c0_17, %c0_18] : memref<8x8xf32, #tpu.memory_space<vmem>>, vector<8x8xf32>
    tpu.vector_store %arg8[%c0_17, %c0_18], %21 {strides = array<i32>} : memref<8x8xf32, #tpu.memory_space<vmem>>, vector<8x8xf32>,
    return
  }
  func.func @transform_0(%arg0: i32) -> (i32, i32) {
    %c0_i32 = arith.constant 0 : i32
    %c0_i32_0 = arith.constant 0 : i32
    return %arg0, %c0_i32 : i32, i32
  }
  func.func @transform_1(%arg0: i32) -> (i32, i32) {
    %c0_i32 = arith.constant 0 : i32
    %c0_i32_0 = arith.constant 0 : i32
    %c0_i32_1 = arith.constant 0 : i32
    return %c0_i32, %c0_i32_0 : i32, i32
  }
  func.func @transform_2(%arg0: i32) -> (i32, i32) {
    %c0_i32 = arith.constant 0 : i32
    %c0_i32_0 = arith.constant 0 : i32
    %c0_i32_1 = arith.constant 0 : i32
    return %c0_i32, %c0_i32_0 : i32, i32
  }
  func.func @transform_3(%arg0: i32) -> (i32, i32) {
    %c0_i32 = arith.constant 0 : i32
    %c0_i32_0 = arith.constant 0 : i32
    %c0_i32_1 = arith.constant 0 : i32
    return %c0_i32, %c0_i32_0 : i32, i32
  }
  func.func @transform_4(%arg0: i32) -> (i32, i32) {
    %c0_i32 = arith.constant 0 : i32
    %c0_i32_0 = arith.constant 0 : i32
    %c0_i32_1 = arith.constant 0 : i32
    return %c0_i32, %c0_i32_0 : i32, i32
  }
  func.func @transform_5(%arg0: i32) -> (i32, i32) {
    %c0_i32 = arith.constant 0 : i32
    %c0_i32_0 = arith.constant 0 : i32
    %c0_i32_1 = arith.constant 0 : i32
    return %c0_i32, %c0_i32_0 : i32, i32
  }
  func.func @transform_6(%arg0: i32) -> (i32, i32) {
    %c0_i32 = arith.constant 0 : i32
    %c0_i32_0 = arith.constant 0 : i32
    %c0_i32_1 = arith.constant 0 : i32
    return %c0_i32, %c0_i32_0 : i32, i32
  }
  func.func @transform_7(%arg0: i32) -> (i32, i32) {
    %c0_i32 = arith.constant 0 : i32
    %c0_i32_0 = arith.constant 0 : i32
    return %arg0, %c0_i32 : i32, i32
  }
}

</mosaic_0001>

<bundles_post_ra>
// kernel: tpu_custom_call.1
= control target key start
LH: loop header
LB: loop body
LE: loop exit
PB: predicated region body
PF: predicated region fallthrough
CT: control target
= control target key end

     0   :  { %12 = vsyncpa [#allocation3], 0  ;;  %s732_s0 = inlined_call_operand.hbm [shape: f32[8,16], index: 0, kind: input, shape index: {}]   ;;  %s733_s1 = inlined_call_operand.hbm [shape: f32[16,128], index: 1, kind: input, shape index: {}]   ;;  %s734_s2 = inlined_call_operand.vmem [shape: f32[1,128], index: 2, kind: input, shape index: {}]   ;;  %s735_s3 = inlined_call_operand.hbm [shape: f32[128,128], index: 3, kind: input, shape index: {}]   ;;  %s736_s4 = inlined_call_operand.vmem [shape: f32[1,128], index: 4, kind: input, shape index: {}]   ;;  %s737_s5 = inlined_call_operand.hbm [shape: f32[128,128], index: 5, kind: input, shape index: {}]   ;;  %s738_s6 = inlined_call_operand.vmem [shape: f32[1,8], index: 6, kind: input, shape index: {}]   ;;  %s739_s7 = inlined_call_operand.hbm [shape: f32[8,8], index: 7, kind: output, shape index: {}]  }
   0x1   :  { %13 = vsyncpa [#allocation6], 0 }
   0x2   :  { %14 = vsyncpa [#allocation9], 0 }
   0x3   :  { %15 = vsyncpa [#allocation4], 0  ;;  %s610_s24 = smov [#allocation5]  }
   0x4   :  { %s31_s25 = sshll.u32 %s610_s24, 4  ;;  %s32_s25 = int_to_ptr.vmem [resolvable:$true] %s31_s25 }
   0x5   :  { %s510_s26 = scalar_lea.vmem %s32_s25, 256  ;;  %p515_p1 = scmp.lt.s32.totalorder %s32_s25, %s32_s25 }
   0x6   :  { %p511_p0 = scmp.ne.s32.totalorder %s32_s25, %s510_s26  ;;  %p516_p2 = scmp.lt.s32.totalorder %s510_s26, %s510_s26 }
   0x8   :  { %p517_p3 = por %p516_p2, %p515_p1 }
   0xa   :  { %p518_p4 = pnand %p517_p3, %p511_p0 }
   0xc   :  { %521 = shalt.err (!%p518_p4)
}
   0xd   :  { %s611_s27 = smov 128   ;;  %s612_s28 = smov 8  }
   0xe   :  { %37 = dma.hbm_to_vmem [thread:$0]  %s733_s1, 256, %s32_s25, [#allocation6], %s611_s27, %s611_s27, %s612_s28  }
   0xf   :  { %s613_s8 = smov [#allocation2]   ;;  %s614_s10 = smov [#allocation7]  }
  0x10   :  { %s22_s9 = sshll.u32 %s613_s8, 4  ;;  %s45_s11 = sshll.u32 %s614_s10, 4  ;;  %s23_s9 = int_to_ptr.vmem [resolvable:$true] %s22_s9  ;;  %s46_s11 = int_to_ptr.vmem [resolvable:$true] %s45_s11 }
  0x11   :  { %s530_s12 = scalar_lea.vmem %s23_s9, 128  ;;  %p535_p6 = scmp.lt.s32.totalorder %s23_s9, %s23_s9 }
  0x12   :  { %p531_p5 = scmp.ne.s32.totalorder %s23_s9, %s530_s12  ;;  %p536_p7 = scmp.lt.s32.totalorder %s530_s12, %s530_s12 }
  0x14   :  { %p537_p8 = por %p536_p7, %p535_p6 }
  0x16   :  { %p538_p9 = pnand %p537_p8, %p531_p5 }
  0x18   :  { %541 = shalt.err (!%p538_p9)
}
  0x19   :  { %25 = dma.hbm_to_vmem [thread:$0]  %s732_s0, 128, %s23_s9, [#allocation3]  }
  0x1a   :  { %s550_s15 = scalar_lea.vmem %s46_s11, 2048  ;;  %p555_p11 = scmp.lt.s32.totalorder %s46_s11, %s46_s11 }
  0x1b   :  { %p551_p10 = scmp.ne.s32.totalorder %s46_s11, %s550_s15  ;;  %p556_p12 = scmp.lt.s32.totalorder %s550_s15, %s550_s15 }
  0x1d   :  { %p557_p13 = por %p556_p12, %p555_p11 }
  0x1f   :  { %p558_p0 = pnand %p557_p13, %p551_p10 }
  0x21   :  { %561 = shalt.err (!%p558_p0)
}
  0x22   :  { %51 = dma.hbm_to_vmem [thread:$0]  %s735_s3, 2048, %s46_s11, [#allocation6], %s611_s27, %s611_s27, %s612_s28  }
  0x23   :  { %s615_s17 = smov [#allocation8]  }
  0x24   :  { %s59_s18 = sshll.u32 %s615_s17, 4  ;;  %s60_s18 = int_to_ptr.vmem [resolvable:$true] %s59_s18 }
  0x25   :  { %s570_s19 = scalar_lea.vmem %s60_s18, 2048  ;;  %p575_p2 = scmp.lt.s32.totalorder %s60_s18, %s60_s18 }
  0x26   :  { %p571_p1 = scmp.ne.s32.totalorder %s60_s18, %s570_s19  ;;  %p576_p3 = scmp.lt.s32.totalorder %s570_s19, %s570_s19 }
  0x28   :  { %p577_p4 = por %p576_p3, %p575_p2 }
  0x2a   :  { %p578_p5 = pnand %p577_p4, %p571_p1 }
  0x2c   :  { %581 = shalt.err (!%p578_p5)
}
  0x2d   :  { %65 = dma.hbm_to_vmem [thread:$0]  %s737_s5, 2048, %s60_s18, [#allocation9], %s611_s27, %s611_s27, %s612_s28  }
  0x2e   :  { %602 = dma.done.wait [#allocation3], 128  }
  0x2f   :  { %603 = vsyncadd [#allocation3], 4294967168 }
  0x30   :  { %604 = dma.done.wait [#allocation6], 2304  }
  0x31   :  { %605 = vsyncadd [#allocation6], 4294964992 }
  0x32   :  { %606 = dma.done.wait [#allocation9], 2048  }
  0x33   :  { %607 = vsyncadd [#allocation9], 4294965248  ;;  %v616_v0 = vmov 0.0   ;;  %vm617_vm0 = vmmov 0   ;;  %v82_v1 = vld [vmem:[#allocation5 + $0x8] sm:$0xff]  ;;  %v81_v2 = vld [vmem:[#allocation5] sm:$0xff] }
  0x34   :  { %414 = vmatprep.subr.mxu0 %v616_v0  ;;  %418 = vmatprep.mubr.msk.f32.mxu0 %vm617_vm0, %v616_v0  ;;  %v80_v3 = vld [vmem:[#allocation2] sm:$0xff]  ;;  %vm90_vm1 = vcmask 130048   ;;  %v180_v4 = vld [vmem:[#allocation7 + $0x78] sm:$0xff]  ;;  %v179_v5 = vld [vmem:[#allocation7 + $0x70] sm:$0xff]  ;;  %s618_s24 = smov [#allocation10]   ;;  %vm354_vm2 = vcmask 64512  }
  0x35   :  { %421 = vmatprep.subr.mxu1 %v616_v0  ;;  %453 = vmatprep.mubr.msk.f32.mxu1 %vm617_vm0, %v616_v0  ;;  %v178_v6 = vld [vmem:[#allocation7 + $0x68] sm:$0xff]  ;;  %v177_v7 = vld [vmem:[#allocation7 + $0x60] sm:$0xff]  ;;  %v176_v8 = vld [vmem:[#allocation7 + $0x58] sm:$0xff]  ;;  %s362_s25 = sshll.u32 %s618_s24, 4  ;;  %s363_s25 = int_to_ptr.vmem [resolvable:$true] %s362_s25 }
  0x36   :  { %415 = vmatpush3.msra.mxu0 %v82_v1  ;;  %422 = vmatpush3.msra.mxu1 %v180_v4  ;;  %v175_v9 = vld [vmem:[#allocation7 + $0x50] sm:$0xff]  ;;  %v174_v10 = vld [vmem:[#allocation7 + $0x48] sm:$0xff]  ;;  %v173_v11 = vld [vmem:[#allocation7 + $0x40] sm:$0xff]  ;;  %p587_p7 = scmp.lt.s32.totalorder %s363_s25, %s363_s25 }
  0x37   :  { %416 = vmatprep.subr.mxu0 %v616_v0  ;;  %423 = vmatprep.subr.mxu1 %v616_v0  ;;  %v172_v12 = vld [vmem:[#allocation7 + $0x38] sm:$0xff]  ;;  %v171_v13 = vld [vmem:[#allocation7 + $0x30] sm:$0xff]  ;;  %v170_v14 = vld [vmem:[#allocation7 + $0x28] sm:$0xff] }
  0x38   :  { %417 = vmatpush3.msra.mxu0 %v81_v2  ;;  %424 = vmatpush3.msra.mxu1 %v179_v5  ;;  %v169_v15 = vld [vmem:[#allocation7 + $0x20] sm:$0xff]  ;;  %v168_v16 = vld [vmem:[#allocation7 + $0x18] sm:$0xff]  ;;  %v167_v17 = vld [vmem:[#allocation7 + $0x10] sm:$0xff] }
  0x39   :  { %419 = vmatmul.mubr.msk.f32.vlgmr.msra.gmra.mxu0 %vm90_vm1, %v80_v3  ;;  %425 = vmatprep.subr.mxu1 %v616_v0  ;;  %v166_v18 = vld [vmem:[#allocation7 + $0x8] sm:$0xff]  ;;  %v165_v19 = vld [vmem:[#allocation7] sm:$0xff]  ;;  %v274_v20 = vld [vmem:[#allocation8 + $0x78] sm:$0xff] }
  0x3a   :  { %456 = vmatprep.subr.mxu0 %v616_v0  ;;  %426 = vmatpush3.msra.mxu1 %v178_v6  ;;  %v273_v21 = vld [vmem:[#allocation8 + $0x70] sm:$0xff]  ;;  %v272_v22 = vld [vmem:[#allocation8 + $0x68] sm:$0xff]  ;;  %v271_v23 = vld [vmem:[#allocation8 + $0x60] sm:$0xff] }
  0x3b   :  { %488 = vmatprep.mubr.msk.f32.mxu0 %vm617_vm0, %v616_v0  ;;  %427 = vmatprep.subr.mxu1 %v616_v0  ;;  %v270_v24 = vld [vmem:[#allocation8 + $0x58] sm:$0xff]  ;;  %v269_v25 = vld [vmem:[#allocation8 + $0x50] sm:$0xff]  ;;  %v268_v26 = vld [vmem:[#allocation8 + $0x48] sm:$0xff] }
  0x3c   :  { %428 = vmatpush3.msra.mxu1 %v177_v7  ;;  %457 = vmatpush3.msra.mxu0 %v274_v20  ;;  %v267_v27 = vld [vmem:[#allocation8 + $0x40] sm:$0xff]  ;;  %v266_v28 = vld [vmem:[#allocation8 + $0x38] sm:$0xff]  ;;  %v265_v29 = vld [vmem:[#allocation8 + $0x30] sm:$0xff] }
  0x3d   :  { %429 = vmatprep.subr.mxu1 %v616_v0  ;;  %458 = vmatprep.subr.mxu0 %v616_v0  ;;  %v264_v30 = vld [vmem:[#allocation8 + $0x28] sm:$0xff]  ;;  %v263_v31 = vld [vmem:[#allocation8 + $0x20] sm:$0xff]  ;;  %v262_v32 = vld [vmem:[#allocation8 + $0x18] sm:$0xff] }
  0x3e   :  { %430 = vmatpush3.msra.mxu1 %v176_v8  ;;  %459 = vmatpush3.msra.mxu0 %v273_v21  ;;  %v373_v33 = vld [vmem:[%s734_s2] ss:$0 sm:$0xff]  ;;  %v261_v38 = vld [vmem:[#allocation8 + $0x10] sm:$0xff]  ;;  %v259_v40 = vld [vmem:[#allocation8] sm:$0xff] }
  0x3f   :  { %431 = vmatprep.subr.mxu1 %v616_v0  ;;  %460 = vmatprep.subr.mxu0 %v616_v0  ;;  %v260_v39 = vld [vmem:[#allocation8 + $0x8] sm:$0xff] }
  0x40   :  { %432 = vmatpush3.msra.mxu1 %v175_v9  ;;  %461 = vmatpush3.msra.mxu0 %v272_v22  ;;  %v375_v41 = vld [vmem:[%s736_s4] ss:$0 sm:$0xff]  ;;  %s582_s4 = scalar_lea.vmem %s363_s25, 128 }
  0x41   :  { %433 = vmatprep.subr.mxu1 %v616_v0  ;;  %462 = vmatprep.subr.mxu0 %v616_v0  ;;  %v376_v46 = vld [vmem:[%s738_s6] ss:$0 sm:$0xff]  ;;  %p583_p6 = scmp.ne.s32.totalorder %s363_s25, %s582_s4  ;;  %p588_p8 = scmp.lt.s32.totalorder %s582_s4, %s582_s4 }
  0x42   :  { %434 = vmatpush3.msra.mxu1 %v174_v10  ;;  %463 = vmatpush3.msra.mxu0 %v271_v23 }
  0x43   :  { %435 = vmatprep.subr.mxu1 %v616_v0  ;;  %464 = vmatprep.subr.mxu0 %v616_v0  ;;  %p589_p9 = por %p588_p8, %p587_p7 }
  0x44   :  { %436 = vmatpush3.msra.mxu1 %v173_v11  ;;  %465 = vmatpush3.msra.mxu0 %v270_v24 }
  0x45   :  { %437 = vmatprep.subr.mxu1 %v616_v0  ;;  %466 = vmatprep.subr.mxu0 %v616_v0  ;;  %p590_p10 = pnand %p589_p9, %p583_p6 }
  0x46   :  { %438 = vmatpush3.msra.mxu1 %v172_v12  ;;  %467 = vmatpush3.msra.mxu0 %v269_v25 }
  0x47   :  { %439 = vmatprep.subr.mxu1 %v616_v0  ;;  %468 = vmatprep.subr.mxu0 %v616_v0 }
  0x48   :  { %440 = vmatpush3.msra.mxu1 %v171_v13  ;;  %469 = vmatpush3.msra.mxu0 %v268_v26 }
  0x49   :  { %441 = vmatprep.subr.mxu1 %v616_v0  ;;  %470 = vmatprep.subr.mxu0 %v616_v0 }
  0x4a   :  { %442 = vmatpush3.msra.mxu1 %v170_v14  ;;  %471 = vmatpush3.msra.mxu0 %v267_v27 }
  0x4b   :  { %443 = vmatprep.subr.mxu1 %v616_v0  ;;  %472 = vmatprep.subr.mxu0 %v616_v0 }
  0x4c   :  { %444 = vmatpush3.msra.mxu1 %v169_v15  ;;  %473 = vmatpush3.msra.mxu0 %v266_v28 }
  0x4d   :  { %445 = vmatprep.subr.mxu1 %v616_v0  ;;  %474 = vmatprep.subr.mxu0 %v616_v0 }
  0x4e   :  { %446 = vmatpush3.msra.mxu1 %v168_v16  ;;  %475 = vmatpush3.msra.mxu0 %v265_v29 }
  0x4f   :  { %447 = vmatprep.subr.mxu1 %v616_v0  ;;  %476 = vmatprep.subr.mxu0 %v616_v0 }
  0x50   :  { %448 = vmatpush3.msra.mxu1 %v167_v17  ;;  %477 = vmatpush3.msra.mxu0 %v264_v30 }
  0x51   :  { %449 = vmatprep.subr.mxu1 %v616_v0  ;;  %478 = vmatprep.subr.mxu0 %v616_v0 }
  0x52   :  { %450 = vmatpush3.msra.mxu1 %v166_v18  ;;  %479 = vmatpush3.msra.mxu0 %v263_v31 }
  0x53   :  { %451 = vmatprep.subr.mxu1 %v616_v0  ;;  %480 = vmatprep.subr.mxu0 %v616_v0 }
  0x54   :  { %452 = vmatpush3.msra.mxu1 %v165_v19  ;;  %481 = vmatpush3.msra.mxu0 %v262_v32 }
  0x55   :  { %482 = vmatprep.subr.mxu0 %v616_v0 }
  0x56   :  { %483 = vmatpush3.msra.mxu0 %v261_v38 }
  0x57   :  { %484 = vmatprep.subr.mxu0 %v616_v0 }
  0x58   :  { %485 = vmatpush3.msra.mxu0 %v260_v39 }
  0x59   :  { %486 = vmatprep.subr.mxu0 %v616_v0 }
  0x5a   :  { %487 = vmatpush3.msra.mxu0 %v259_v40 }
  0xf9   :  { %v160_v34 = vpop.f32.mrf.mxu0 }
  0xfa   :  { %v161_v35 = vadd.f32 %v373_v33, %v160_v34 }
  0xfb   :  { %v420_v36 = vpop.f32.mrf.mxu0 }
  0xfc   :  { %v164_v37 = vmax.f32 %v161_v35, 0.0 }
  0xfe   :  { %454 = vmatmul.mubr.f32.vlgmr.msra.gmra.mxu1 %v164_v37 }
 0x1be   :  { %v254_v42 = vpop.f32.mrf.mxu1 }
 0x1bf   :  { %v255_v43 = vadd.f32 %v375_v41, %v254_v42 }
 0x1c0   :  { %v455_v44 = vpop.f32.mrf.mxu1 }
 0x1c1   :  { %v258_v45 = vmax.f32 %v255_v43, 0.0 }
 0x1c3   :  { %489 = vmatmul.mubr.f32.vlgmr.msra.gmra.mxu0 %v258_v45 }
 0x283   :  { %v341_v47 = vpop.f32.mrf.mxu0 }
 0x284   :  { %v352_v48 = vadd.f32 %v376_v46, %v341_v47 }
 0x285   :  { %v490_v49 = vpop.f32.mrf.mxu0 }
 0x286   :  { %500 = vtanh.f32 %v352_v48 }
 0x293   :  { %v501_v50 = vpop.eup %500 }
 0x294   :  { %355 = vst.msk [vmem:[#allocation10] sm:$0xff] %vm354_vm2, %v501_v50 }
 0x295   :  { %593 = shalt.err (!%p590_p10)
}
 0x296   :  { %365 = dma.vmem_to_hbm [thread:$0]  %s363_s25, 128, %s739_s7, [#allocation4]  }
 0x297   :  { %608 = dma.done.wait [#allocation4], 128  }
 0x298   :  { %609 = vsyncadd [#allocation4], 4294967168 }
 0x299   :  { %369 = vsyncpa [#allocation3], 1 }
 0x29a   :  { %370 = vsyncpa [#allocation6], 1 }
 0x29b   :  { %371 = vsyncpa [#allocation9], 1 }
 0x29c   :  { %372 = vsyncpa [#allocation4], 1 }

</bundles_post_ra>
